<compile_context>
chip_gen: v7x
topology: tpu7x:2x2x1
jax: 0.10.0
libtpu: 0.0.40
codegen_flags: <defaults>
</compile_context>

<pallas_src>
import functools

import jax
import jax.numpy as jnp
from jax.experimental import pallas as pl
from jax.experimental.pallas import tpu as pltpu


_VMEM_LIMIT_BYTES = 48 * 1024 * 1024      # scoped-VMEM request (safe on v5e/v6e/v7x)
_BUFFER_BUDGET_BYTES = 28 * 1024 * 1024   # budget for explicit (double-buffered) tiles
_STEP_OVERHEAD_S = 0.35e-6                # fixed per-grid-step cost
_HBM_BW = 1.3e12                          # rough; only used to rank tile candidates
_MXU_BF16 = 9.0e14
_MXU_F32 = 2.3e14


def _round_up(x: int, m: int) -> int:
    return ((x + m - 1) // m) * m


def _cdiv(a: int, b: int) -> int:
    return (a + b - 1) // b


def _choose_tiles(rows, hidden, intermediate, itemsize, row_align, tm_max=1024):
    """Pick (tm, tk) with a tiny roofline model under a VMEM buffer budget."""
    # tk candidates: 128-multiple divisors of `intermediate`, plus `intermediate`
    # itself (weights fully VMEM-resident), largest first.
    tk_cands = {intermediate}
    for d in range(128, intermediate, 128):
        if intermediate % d == 0:
            tk_cands.add(d)
    tk_cands = sorted(tk_cands, reverse=True)

    # tm candidates: multiples of the sublane alignment, capped by rows and tm_max.
    tm_cap = min(tm_max, _round_up(rows, row_align))
    tm_cands = list(range(row_align, tm_cap + 1, row_align))
    # Megacore: keep >= 2 row tiles whenever the row count allows it, so both v7x
    # TensorCores get work under dimension_semantics=("parallel", ...).
    if rows > row_align:
        tm_cands = [t for t in tm_cands if t < rows] or [row_align]

    mxu = _MXU_BF16 if itemsize <= 2 else _MXU_F32
    flops = 4.0 * rows * hidden * intermediate
    act_bytes = 2.0 * rows * hidden * itemsize
    w_bytes = 2.0 * hidden * intermediate * itemsize

    def fits(tm, tk):
        weights = 4 * hidden * tk * itemsize          # W_fc + W_proj slices, double-buffered
        biases = 2 * (tk + hidden) * itemsize
        xo = 4 * tm * hidden * itemsize               # x + out tiles, double-buffered
        acc = tm * hidden * 4                         # f32 accumulator scratch
        inter = tm * tk * 4                           # in-kernel f32 GELU temporary
        return weights + biases + xo + acc + inter <= _BUFFER_BUDGET_BYTES

    def score(tm, tk):
        n_row = _cdiv(rows, tm)
        n_k = intermediate // tk
        # Weights are fetched once when the k axis collapses (constant index map)
        # or when there is a single row tile; otherwise re-streamed per row tile.
        streams = 1 if (tk == intermediate or n_row == 1) else n_row
        hbm_s = (streams * w_bytes + act_bytes) / _HBM_BW
        mxu_s = flops / mxu
        return max(hbm_s, mxu_s) + n_row * n_k * _STEP_OVERHEAD_S

    best = None
    for tm in tm_cands:
        for tk in tk_cands:
            if not fits(tm, tk):
                continue
            s = score(tm, tk)
            if best is None or s < best[0]:
                best = (s, tm, tk)
    if best is None:  # nothing fits the budget: fall back to the smallest legal tiles
        return tm_cands[0], min(tk_cands)
    return best[1], best[2]


def _new_gelu(h):
    # NewGELUActivation (HF GPT-2 tanh approximation):
    #   0.5 * h * (1 + tanh(sqrt(2/pi) * (h + 0.044715 * h^3)))
    # Inner polynomial factored as h * (1 + 0.044715*h*h) to drop one [tm, tk]
    # f32 multiply per step (VPU); tanh runs on the EUP slot.
    c = jnp.float32(0.7978845608028654)  # sqrt(2/pi)
    return 0.5 * h * (1.0 + jnp.tanh(c * (h * (1.0 + 0.044715 * (h * h)))))


def _gpt2_mlp_kernel(x_ref, wfc_ref, bfc_ref, wproj_ref, bproj_ref, o_ref, acc_ref):
    """One (row-tile, k-tile) step of  GELU_new(x @ Wfc + bfc) @ Wproj + bproj,
    with the intermediate dim tiled along grid axis 1 (reduction)."""
    k = pl.program_id(1)

    @pl.when(k == 0)
    def _():
        acc_ref[...] = jnp.zeros_like(acc_ref)

    # c_fc partial: [tm, hidden] @ [hidden, tk] -> [tm, tk], f32 accumulation on MXU.
    h = jnp.dot(x_ref[...], wfc_ref[...], preferred_element_type=jnp.float32)
    h = h + bfc_ref[...].astype(jnp.float32)
    a = _new_gelu(h)

    # c_proj partial: [tm, tk] @ [tk, hidden] -> accumulate into f32 scratch.
    acc_ref[...] += jnp.dot(
        a.astype(wproj_ref.dtype), wproj_ref[...],
        preferred_element_type=jnp.float32,
    )

    @pl.when(k == pl.num_programs(1) - 1)
    def _():
        out = acc_ref[...] + bproj_ref[...].astype(jnp.float32)
        o_ref[...] = out.astype(o_ref.dtype)


def _gpt2_mlp_kernel_resident(x_ref, wfc_ref, bfc_ref, wproj_ref, bproj_ref, o_ref):
    """Single k-step variant (tk == intermediate): weight blocks are constant across
    the grid (VMEM-resident), so no f32 accumulator scratch / VMEM round-trip."""
    h = jnp.dot(x_ref[...], wfc_ref[...], preferred_element_type=jnp.float32)
    h = h + bfc_ref[...].astype(jnp.float32)
    a = _new_gelu(h)
    out = jnp.dot(a.astype(wproj_ref.dtype), wproj_ref[...],
                  preferred_element_type=jnp.float32)
    o_ref[...] = (out + bproj_ref[...].astype(jnp.float32)).astype(o_ref.dtype)


@functools.partial(jax.jit, static_argnames=("tm", "tk"))
def gpt2_mlp(hidden_states, w_fc, b_fc, w_proj, b_proj, *, tm=None, tk=None):
    """GPT2MLP forward (eval mode; dropout == identity).

    Args:
      hidden_states: [batch, seq, hidden]
      w_fc:   [hidden, intermediate]   (Conv1D weight, nx x nf layout)
      b_fc:   [intermediate]
      w_proj: [intermediate, hidden]
      b_proj: [hidden]
      tm, tk: optional tile overrides (rows / intermediate). Auto-chosen if None.
    Returns:
      [batch, seq, hidden]
    """
    batch, seq, hidden = hidden_states.shape
    intermediate = w_fc.shape[1]
    rows = batch * seq
    itemsize = hidden_states.dtype.itemsize
    row_align = 32 if itemsize == 1 else (16 if itemsize == 2 else 8)

    tm_auto, tk_auto = _choose_tiles(rows, hidden, intermediate, itemsize, row_align)
    tm_eff = tm_auto if tm is None else tm
    tk_eff = tk_auto if tk is None else tk

    # Sanitize / validate tile sizes.
    tm_eff = max(row_align, _round_up(min(tm_eff, _round_up(rows, row_align)), row_align))
    if intermediate % tk_eff != 0:
        raise ValueError("tk must divide the intermediate dimension (reduction axis).")
    if tk_eff != intermediate and tk_eff % 128 != 0:
        raise ValueError("tk must be a multiple of 128 or equal to intermediate.")

    n_row = _cdiv(rows, tm_eff)          # ragged last tile handled by Pallas masking
    n_k = intermediate // tk_eff

    x2d = hidden_states.reshape(rows, hidden)
    b_fc2d = b_fc.reshape(1, intermediate)
    b_proj2d = b_proj.reshape(1, hidden)

    # Advisory cost estimate: weights are re-streamed once per row tile unless the
    # k axis collapses (or there is only one row tile).
    weight_streams = 1 if (n_k == 1 or n_row == 1) else n_row
    weight_bytes = (w_fc.size * w_fc.dtype.itemsize
                    + w_proj.size * w_proj.dtype.itemsize)
    bias_bytes = (b_fc.size * b_fc.dtype.itemsize
                  + b_proj.size * b_proj.dtype.itemsize)
    cost = pl.CostEstimate(
        flops=4 * rows * hidden * intermediate,
        transcendentals=rows * intermediate,
        bytes_accessed=int(2 * rows * hidden * itemsize
                           + weight_streams * weight_bytes + bias_bytes),
    )

    if n_k == 1:
        kernel = _gpt2_mlp_kernel_resident
        scratch = []
    else:
        kernel = _gpt2_mlp_kernel
        scratch = [pltpu.VMEM((tm_eff, hidden), jnp.float32)]

    out2d = pl.pallas_call(
        kernel,
        out_shape=jax.ShapeDtypeStruct((rows, hidden), hidden_states.dtype),
        grid_spec=pltpu.PrefetchScalarGridSpec(
            num_scalar_prefetch=0,
            grid=(n_row, n_k),
            in_specs=[
                pl.BlockSpec((tm_eff, hidden), lambda i, k: (i, 0)),    # x row tile
                pl.BlockSpec((hidden, tk_eff), lambda i, k: (0, k)),    # W_fc k-slice
                pl.BlockSpec((1, tk_eff), lambda i, k: (0, k)),         # b_fc k-slice
                pl.BlockSpec((tk_eff, hidden), lambda i, k: (k, 0)),    # W_proj k-slice
                pl.BlockSpec((1, hidden), lambda i, k: (0, 0)),         # b_proj
            ],
            out_specs=pl.BlockSpec((tm_eff, hidden), lambda i, k: (i, 0)),
            scratch_shapes=scratch,
        ),
        compiler_params=pltpu.CompilerParams(
            dimension_semantics=("parallel", "arbitrary"),
            vmem_limit_bytes=_VMEM_LIMIT_BYTES,
        ),
        cost_estimate=cost,
    )(x2d, w_fc, b_fc2d, w_proj, b_proj2d)

    return out2d.reshape(batch, seq, hidden)


def _reference_mlp(x, w_fc, b_fc, w_proj, b_proj):
    """Pure-JAX reference of the PyTorch GPT2MLP forward (eval mode)."""
    h = jnp.einsum("bsh,hi->bsi", x, w_fc) + b_fc
    c = jnp.sqrt(2.0 / jnp.pi)
    a = 0.5 * h * (1.0 + jnp.tanh(c * (h + 0.044715 * h**3)))
    return jnp.einsum("bsi,ih->bsh", a, w_proj) + b_proj


if __name__ == "__main__":
    # Small GPT-2-like config: hidden=32, intermediate=4*hidden=128, batch=2, seq=8
    batch, seq, hidden = 2, 8, 32
    intermediate = 4 * hidden

    key = jax.random.PRNGKey(0)
    kx, k1, k2, _, _ = jax.random.split(key, 5)

    x = jax.random.normal(kx, (batch, seq, hidden), dtype=jnp.float32)
    # Conv1D init in HF is normal(std=0.02) weights, zero bias.
    w_fc = 0.02 * jax.random.normal(k1, (hidden, intermediate), dtype=jnp.float32)
    b_fc = jnp.zeros((intermediate,), dtype=jnp.float32)
    w_proj = 0.02 * jax.random.normal(k2, (intermediate, hidden), dtype=jnp.float32)
    b_proj = jnp.zeros((hidden,), dtype=jnp.float32)

    out = gpt2_mlp(x, w_fc, b_fc, w_proj, b_proj)
    out = jax.block_until_ready(out)

    ref = _reference_mlp(x, w_fc, b_fc, w_proj, b_proj)
    assert out.shape == (batch, seq, hidden)
    assert jnp.allclose(out, ref, atol=2e-5, rtol=1e-5), "mismatch vs reference"

    print("KERNEL_OK")
</pallas_src>

<mosaic_0001>
module attributes {stable_mosaic.version = 11 : i64} {
  func.func @_gpt2_mlp_kernel_resident(%arg0: i32, %arg1: i32, %arg2: memref<8x32xf32, #tpu.memory_space<vmem>>, %arg3: memref<32x128xf32, #tpu.memory_space<vmem>>, %arg4: memref<1x128xf32, #tpu.memory_space<vmem>>, %arg5: memref<128x32xf32, #tpu.memory_space<vmem>>, %arg6: memref<1x32xf32, #tpu.memory_space<vmem>>, %arg7: memref<8x32xf32, #tpu.memory_space<vmem>>) attributes {dimension_semantics = [#tpu.dimension_semantics<parallel>, #tpu.dimension_semantics<arbitrary>], iteration_bounds = array<i64: 2, 1>, scalar_prefetch = 0 : i64, scratch_operands = 0 : i64, tpu.core_type = #tpu.core_type<tc>, window_params = [{transform_indices = @transform_0, window_bounds = array<i64: 8, 32>}, {transform_indices = @transform_1, window_bounds = array<i64: 32, 128>}, {transform_indices = @transform_2, window_bounds = array<i64: 1, 128>}, {transform_indices = @transform_3, window_bounds = array<i64: 128, 32>}, {pipeline_mode = #tpu.pipeline_mode<synchronous>, transform_indices = @transform_4, window_bounds = array<i64: 1, 32>}, {transform_indices = @transform_5, window_bounds = array<i64: 8, 32>}]} {
    %c0 = arith.constant 0 : index
    %c0_0 = arith.constant 0 : index
    %0 = vector.load %arg2[%c0, %c0_0] : memref<8x32xf32, #tpu.memory_space<vmem>>, vector<8x32xf32>
    %c0_1 = arith.constant 0 : index
    %c0_2 = arith.constant 0 : index
    %1 = vector.load %arg3[%c0_1, %c0_2] : memref<32x128xf32, #tpu.memory_space<vmem>>, vector<32x128xf32>
    %cst = arith.constant dense<0.000000e+00> : vector<8x128xf32>
    %2 = tpu.matmul %0, %1, %cst {dimension_numbers = #tpu.dot_dimension_numbers<[1], [0], [0], [1], [0, 0, 1, 1], [], []>} : vector<8x32xf32>, vector<32x128xf32>, vector<8x128xf32> -> vector<8x128xf32>
    %c0_3 = arith.constant 0 : index
    %c0_4 = arith.constant 0 : index
    %3 = vector.load %arg4[%c0_3, %c0_4] : memref<1x128xf32, #tpu.memory_space<vmem>>, vector<1x128xf32>
    %4 = vector.broadcast %3 : vector<1x128xf32> to vector<8x128xf32>
    %5 = arith.addf %2, %4 : vector<8x128xf32>
    %cst_5 = arith.constant 5.000000e-01 : f32
    %6 = vector.broadcast %cst_5 : f32 to vector<8x128xf32>
    %7 = arith.mulf %6, %5 : vector<8x128xf32>
    %8 = arith.mulf %5, %5 : vector<8x128xf32>
    %cst_6 = arith.constant 4.471500e-02 : f32
    %9 = vector.broadcast %cst_6 : f32 to vector<8x128xf32>
    %10 = arith.mulf %9, %8 : vector<8x128xf32>
    %cst_7 = arith.constant 1.000000e+00 : f32
    %11 = vector.broadcast %cst_7 : f32 to vector<8x128xf32>
    %12 = arith.addf %11, %10 : vector<8x128xf32>
    %13 = arith.mulf %5, %12 : vector<8x128xf32>
    %cst_8 = arith.constant 0.797884583 : f32
    %14 = vector.broadcast %cst_8 : f32 to vector<8x128xf32>
    %15 = arith.mulf %14, %13 : vector<8x128xf32>
    %16 = math.tanh %15 : vector<8x128xf32>
    %cst_9 = arith.constant 1.000000e+00 : f32
    %17 = vector.broadcast %cst_9 : f32 to vector<8x128xf32>
    %18 = arith.addf %17, %16 : vector<8x128xf32>
    %19 = arith.mulf %7, %18 : vector<8x128xf32>
    %c0_10 = arith.constant 0 : index
    %c0_11 = arith.constant 0 : index
    %20 = vector.load %arg5[%c0_10, %c0_11] : memref<128x32xf32, #tpu.memory_space<vmem>>, vector<128x32xf32>
    %cst_12 = arith.constant dense<0.000000e+00> : vector<8x32xf32>
    %21 = tpu.matmul %19, %20, %cst_12 {dimension_numbers = #tpu.dot_dimension_numbers<[1], [0], [0], [1], [0, 0, 1, 1], [], []>} : vector<8x128xf32>, vector<128x32xf32>, vector<8x32xf32> -> vector<8x32xf32>
    %c0_13 = arith.constant 0 : index
    %c0_14 = arith.constant 0 : index
    %22 = vector.load %arg6[%c0_13, %c0_14] : memref<1x32xf32, #tpu.memory_space<vmem>>, vector<1x32xf32>
    %23 = vector.broadcast %22 : vector<1x32xf32> to vector<8x32xf32>
    %24 = arith.addf %21, %23 : vector<8x32xf32>
    %c0_15 = arith.constant 0 : index
    %c0_16 = arith.constant 0 : index
    %25 = vector.load %arg7[%c0_15, %c0_16] : memref<8x32xf32, #tpu.memory_space<vmem>>, vector<8x32xf32>
    tpu.vector_store %arg7[%c0_15, %c0_16], %24 {strides = array<i32>} : memref<8x32xf32, #tpu.memory_space<vmem>>, vector<8x32xf32>,
    return
  }
  func.func @transform_0(%arg0: i32, %arg1: i32) -> (i32, i32) {
    %c0_i32 = arith.constant 0 : i32
    %c0_i32_0 = arith.constant 0 : i32
    return %arg0, %c0_i32 : i32, i32
  }
  func.func @transform_1(%arg0: i32, %arg1: i32) -> (i32, i32) {
    %c0_i32 = arith.constant 0 : i32
    %c0_i32_0 = arith.constant 0 : i32
    return %c0_i32, %arg1 : i32, i32
  }
  func.func @transform_2(%arg0: i32, %arg1: i32) -> (i32, i32) {
    %c0_i32 = arith.constant 0 : i32
    %c0_i32_0 = arith.constant 0 : i32
    return %c0_i32, %arg1 : i32, i32
  }
  func.func @transform_3(%arg0: i32, %arg1: i32) -> (i32, i32) {
    %c0_i32 = arith.constant 0 : i32
    %c0_i32_0 = arith.constant 0 : i32
    return %arg1, %c0_i32 : i32, i32
  }
  func.func @transform_4(%arg0: i32, %arg1: i32) -> (i32, i32) {
    %c0_i32 = arith.constant 0 : i32
    %c0_i32_0 = arith.constant 0 : i32
    %c0_i32_1 = arith.constant 0 : i32
    return %c0_i32, %c0_i32_0 : i32, i32
  }
  func.func @transform_5(%arg0: i32, %arg1: i32) -> (i32, i32) {
    %c0_i32 = arith.constant 0 : i32
    %c0_i32_0 = arith.constant 0 : i32
    return %arg0, %c0_i32 : i32, i32
  }
}

</mosaic_0001>

<bundles_post_ra>
// kernel: gpt2_mlp.1
= control target key start
LH: loop header
LB: loop body
LE: loop exit
PB: predicated region body
PF: predicated region fallthrough
CT: control target
= control target key end

     0   :  { %10 = vsyncpa [#allocation3], 0  ;;  %s1066_s0 = inlined_call_operand.vmem [shape: f32[16,32], index: 0, kind: input, shape index: {}]   ;;  %s1067_s1 = inlined_call_operand.vmem [shape: f32[32,128], index: 1, kind: input, shape index: {}]   ;;  %s1068_s2 = inlined_call_operand.vmem [shape: f32[1,128], index: 2, kind: input, shape index: {}]   ;;  %s1069_s3 = inlined_call_operand.vmem [shape: f32[128,32], index: 3, kind: input, shape index: {}]   ;;  %s1070_s4 = inlined_call_operand.vmem [shape: f32[1,32], index: 4, kind: input, shape index: {}]   ;;  %s1071_s5 = inlined_call_operand.hbm [shape: f32[16,32], index: 5, kind: output, shape index: {}]  }
   0x1   :  { %12 = vsyncpa [#allocation3 + $0x1], 0  ;;  %s886_s18 = smov 0   ;;  %s888_s19 = smov 0  }
   0x2   :  { %s890_s20 = smov 0   ;;  %s892_s21 = smov 0  }
   0x3   :  { %s894_s22 = smov 0   ;;  %s896_s23 = smov 0  }
   0x4 LB: > { %s597_s24 = sadd.s32 4294967295, %s850_s23   ;;  %s598_s25 = sadd.s32 4294967294, %s850_s23   ;;  %s850_s23 = sphi %s896_s23, %s18_s23   ;;  %s846_s22 = sphi %s894_s22, %s1078_s22   ;;  %s842_s21 = sphi %s892_s21, %s1077_s21   ;;  %s838_s20 = sphi %s890_s20, %s1076_s20   ;;  %s834_s19 = sphi %s888_s19, %s1075_s19   ;;  %s830_s18 = sphi %s886_s18, %s1074_s18  }
   0x5   : > { %s30_s26 = sadd.s32 1, %s846_s22  ;;  %s162_s27 = sadd.s32 1, %s838_s20 }
   0x6   : > { %p32_p0 = scmp.ge.s32.totalorder %s30_s26, 2  ;;  %p172_p1 = scmp.ne.s32.totalorder %s838_s20, %s834_s19 }
   0x7   : > { %p173_p2 = scmp.eq.s32.totalorder %s597_s24, 1  ;;  %p178_p3 = scmp.ne.s32.totalorder %s834_s19, %s830_s18 }
   0x8   : > { %s1080_s26 = smov (%p32_p0, %s30_s26), 0  ;;  %p179_p5 = scmp.eq.s32.totalorder %s598_s25, 1 }
   0x9   : > { %p926_p4 = por %p173_p2, %p172_p1  ;;  %s159_s29 = ssub.s32 %s846_s22, %s1080_s26 }
   0xa   : > { %p604_p6 = scmp.ge.s32.totalorder %s850_s23, 1  ;;  %p160_p7 = scmp.eq.s32.totalorder %s159_s29, 0 }
   0xb   : > { %p933_p8 = por %p179_p5, %p178_p3  ;;  %p229_p9 = scmp.lt.s32.totalorder %s850_s23, 3 }
   0xc   : > { %s939_s6 = scalar_select %p160_p7, %s838_s20, %s162_s27  }
   0xd   : > { %p230_p10 = pnand %p604_p6, %p229_p9 }
   0xe   : > { %v286_v0 = vld [vmem:[%s1067_s1] sm:$0xff] (!%p230_p10)  ;;  %v287_v1 = vld [vmem:[%s1067_s1 + $0x8] sm:$0xff] (!%p230_p10)  ;;  %v288_v2 = vld [vmem:[%s1067_s1 + $0x10] sm:$0xff] (!%p230_p10)  ;;  %v852_v3 = vmov (!%p230_p10), 0.0|0.0   ;;  %vm853_vm0 = vmmov (!%p230_p10), 0   ;;  %v854_v6 = vmov (!%p230_p10), 0.0  }
   0xf   : > { %233 = sbr.rel (%p230_p10) target bundleno = 494 (0x1ee), region = 40  ;;  %682 = vmatprep.subr.bf16.mxu0 (!%p230_p10), %v852_v3  ;;  %v683_v4 = vpack.c.bf16 (!%p230_p10), %v287_v1, %v286_v0  ;;  %v289_v5 = vld [vmem:[%s1067_s1 + $0x18] sm:$0xff] (!%p230_p10)  ;;  %644 = vmatprep.mubr.msk.f32.mxu0 (!%p230_p10), %vm853_vm0, %v854_v6  ;;  %p268_p11 = scmp.lt.s32.totalorder (!%p230_p10), %s842_s21, 1  ;;  %v380_v7 = vld [vmem:[%s1069_s3] sm:$0xff] (!%p230_p10)  ;;  %v381_v8 = vld [vmem:[%s1069_s3 + $0x8] sm:$0xff] (!%p230_p10)  ;;  %vm297_vm1 = vcmask (!%p230_p10), 261120  }
  0x10   : > { %688 = vmatprep.subr.bf16.mxu1 (!%p230_p10), %v852_v3  ;;  %v689_v9 = vpack.c.bf16 (!%p230_p10), %v381_v8, %v380_v7  ;;  %679 = vmatprep.mubr.msk.f32.mxu1 (!%p230_p10), %vm853_vm0, %v854_v6  ;;  %v686_v10 = vpack.c.bf16 (!%p230_p10), %v289_v5, %v288_v2  ;;  %v382_v12 = vld [vmem:[%s1069_s3 + $0x10] sm:$0xff] (!%p230_p10)  ;;  %v383_v13 = vld [vmem:[%s1069_s3 + $0x18] sm:$0xff] (!%p230_p10)  ;;  %v384_v15 = vld [vmem:[%s1069_s3 + $0x20] sm:$0xff] (!%p230_p10)  ;;  %s265_s9 = sand.u32 (!%p230_p10), 1, %s834_s19   ;;  %s611_s13 = sshll.u32 (!%p230_p10), %s842_s21, 7 }
  0x11   : > { %684 = vmatpush3.bf16.msra.mxu0 (!%p230_p10), %v683_v4  ;;  %v692_v14 = vpack.c.bf16 (!%p230_p10), %v383_v13, %v382_v12  ;;  %v385_v16 = vld [vmem:[%s1069_s3 + $0x28] sm:$0xff] (!%p230_p10)  ;;  %v386_v18 = vld [vmem:[%s1069_s3 + $0x30] sm:$0xff] (!%p230_p10)  ;;  %v387_v19 = vld [vmem:[%s1069_s3 + $0x38] sm:$0xff] (!%p230_p10)  ;;  %s605_s10 = sshll.u32 (!%p230_p10), %s265_s9, 3  ;;  %s1018_s24 = scalar_lea.hbm (!%p230_p10), %s1071_s5, %s611_s13 }
  0x12   : > { %685 = vmatprep.subr.bf16.mxu0 (!%p230_p10), %v852_v3  ;;  %690 = vmatpush3.bf16.msra.mxu1 (!%p230_p10), %v689_v9  ;;  %v695_v17 = vpack.c.bf16 (!%p230_p10), %v385_v16, %v384_v15  ;;  %v698_v20 = vpack.c.bf16 (!%p230_p10), %v387_v19, %v386_v18  ;;  %v388_v21 = vld [vmem:[%s1069_s3 + $0x40] sm:$0xff] (!%p230_p10)  ;;  %v389_v22 = vld [vmem:[%s1069_s3 + $0x48] sm:$0xff] (!%p230_p10)  ;;  %v390_v24 = vld [vmem:[%s1069_s3 + $0x50] sm:$0xff] (!%p230_p10)  ;;  %s267_s14 = scalar_lea.vmem (!%p230_p10), [#allocation2], %s605_s10 }
  0x13   : > { %691 = vmatprep.subr.bf16.mxu1 (!%p230_p10), %v852_v3  ;;  %v701_v23 = vpack.c.bf16 (!%p230_p10), %v389_v22, %v388_v21  ;;  %v391_v25 = vld [vmem:[%s1069_s3 + $0x58] sm:$0xff] (!%p230_p10)  ;;  %v392_v27 = vld [vmem:[%s1069_s3 + $0x60] sm:$0xff] (!%p230_p10)  ;;  %v393_v28 = vld [vmem:[%s1069_s3 + $0x68] sm:$0xff] (!%p230_p10)  ;;  %s488_s15 = sshll.u32 (!%p230_p10), %s267_s14, 4  ;;  %s1020_s15 = int_to_ptr.vmem [resolvable:$true] %s488_s15 }
  0x14   : > { %v704_v26 = vpack.c.bf16 (!%p230_p10), %v391_v25, %v390_v24  ;;  %v707_v29 = vpack.c.bf16 (!%p230_p10), %v393_v28, %v392_v27  ;;  %v394_v30 = vld [vmem:[%s1069_s3 + $0x70] sm:$0xff] (!%p230_p10)  ;;  %v395_v31 = vld [vmem:[%s1069_s3 + $0x78] sm:$0xff] (!%p230_p10)  ;;  %v607_v33 = vld [vmem:[%s1068_s2] ss:$0 sm:$0xff] (!%p230_p10) }
  0x15   : > { %687 = vmatpush3.bf16.msra.mxu0 (!%p230_p10), %v686_v10  ;;  %v710_v32 = vpack.c.bf16 (!%p230_p10), %v395_v31, %v394_v30  ;;  %v609_v46 = vld [vmem:[%s1070_s4] ss:$0 sm:$0xff] (!%p230_p10) }
  0x16   : > { %s269_s25 = scalar_select %p268_p11, %s842_s21, 1  ;;  %693 = vmatpush3.bf16.msra.mxu1 %v692_v14 }
  0x17   : > { %694 = vmatprep.subr.bf16.mxu1 %v852_v3  ;;  %s855_s21 = smov [#allocation2]  }
  0x18   : > { %s606_s27 = sshll.u32 %s269_s25, 3  ;;  %s475_s25 = scalar_lea.sflag [#allocation3], %s265_s9 }
  0x19   : > { %s271_s8 = scalar_lea.vmem %s1066_s0, %s606_s27  ;;  %s772_s27 = scalar_lea.vmem %s1020_s15, 128 }
  0x1a   : > { %v285_v11 = vld [vmem:[%s271_s8] sm:$0xff]  ;;  %696 = vmatpush3.bf16.msra.mxu1 %v695_v17  ;;  %p773_p12 = scmp.ne.s32.totalorder %s1020_s15, %s772_s27  ;;  %s776_s29 = sshll.u32 %s855_s21, 4  ;;  %s777_s29 = int_to_ptr.vmem [resolvable:$false] %s776_s29 }
  0x1b   : > { %645 = vmatmul.mubr.msk.f32.vlgmr.msra.gmra.mrb[0].mxu0 %vm297_vm1, %v285_v11  ;;  %697 = vmatprep.subr.bf16.mxu1 %v852_v3  ;;  %s778_s7 = scalar_lea.vmem %s777_s29, 256  ;;  %p779_p1 = scmp.lt.s32.totalorder %s1020_s15, %s777_s29 }
  0x1c   : > { %p774_p13 = pnand %p773_p12, %p926_p4  ;;  %p780_p2 = scmp.lt.s32.totalorder %s778_s7, %s772_s27 }
  0x1e   : > { %699 = vmatpush3.bf16.msra.mxu1 %v698_v20  ;;  %p775_p0 = pneg %p774_p13  ;;  %p781_p3 = por %p780_p2, %p779_p1 }
  0x1f   : > { %700 = vmatprep.subr.bf16.mxu1 %v852_v3 }
  0x20   : > { %p782_p5 = pnand %p781_p3, %p775_p0 }
  0x22   : > { %702 = vmatpush3.bf16.msra.mxu1 %v701_v23 }
  0x23   : > { %703 = vmatprep.subr.bf16.mxu1 %v852_v3 }
  0x26   : > { %705 = vmatpush3.bf16.msra.mxu1 %v704_v26 }
  0x27   : > { %706 = vmatprep.subr.bf16.mxu1 %v852_v3 }
  0x2a   : > { %708 = vmatpush3.bf16.msra.mxu1 %v707_v29 }
  0x2b   : > { %709 = vmatprep.subr.bf16.mxu1 %v852_v3 }
  0x2e   : > { %711 = vmatpush3.bf16.msra.mxu1 %v710_v32 }
  0xee   : > { %v367_v34 = vpop.f32.mrb[0].mxu0 }
  0xef   : > { %v368_v35 = vadd.f32 %v607_v33, %v367_v34  ;;  %v646_v36 = vpop.f32.mrb[1].mxu0 }
  0xf1   : > { %v372_v37 = vmul.f32 %v368_v35, %v368_v35  ;;  %v371_v43 = vmul.f32 0.5, %v368_v35 }
  0xf3   : > { %v373_v38 = vmul.f32 0.044715, %v372_v37 }
  0xf5   : > { %v374_v39 = vadd.f32 1.0, %v373_v38 }
  0xf7   : > { %v375_v40 = vmul.f32 %v374_v39, %v368_v35 }
  0xf9   : > { %v376_v41 = vmul.f32 0.7978846, %v375_v40 }
  0xfb   : > { %770 = vtanh.f32 %v376_v41 }
 0x105   : > { %v771_v42 = vpop.eup %770 }
 0x106   : > { %v378_v44 = vadd.f32 1.0, %v771_v42 }
 0x108   : > { %v379_v45 = vmul.f32 %v378_v44, %v371_v43 }
 0x10a   : > { %680 = vmatmul.mubr.f32.vlgmr.msra.gmra.mrb[0].mxu1 %v379_v45 }
 0x1dd   : > { %v469_v47 = vpop.f32.mrb[0].mxu1 }
 0x1de   : > { %v470_v48 = vadd.f32 %v609_v46, %v469_v47  ;;  %v681_v49 = vpop.f32.mrb[1].mxu1 }
 0x1e0   : > { %473 = vst.msk [vmem:[%s267_s14] sm:$0xff] %vm297_vm1, %v470_v48 }
 0x1e1   : > { %785 = shalt.err (!%p782_p5)
}
 0x1e2   : > { %s786_s8 = scalar_lea.hbm %s1018_s24, 128  ;;  %s790_s11 = scalar_lea.hbm %s1071_s5, 256 }
 0x1e3   : > { %p787_p6 = scmp.ne.s32.totalorder %s1018_s24, %s786_s8  ;;  %p791_p10 = scmp.lt.u32.totalorder %s1018_s24, %s1071_s5 }
 0x1e4   : > { %p792_p11 = scmp.lt.u32.totalorder %s790_s11, %s786_s8  ;;  %p794_p13 = scmp.lt.u32.totalorder %s786_s8, %s1018_s24 }
 0x1e5   : > { %p788_p7 = pnand %p787_p6, %p926_p4 }
 0x1e6   : > { %p793_p12 = por %p792_p11, %p791_p10 }
 0x1e7   : > { %p789_p9 = pneg %p788_p7 }
 0x1e8   : > { %p795_p0 = por %p794_p13, %p793_p12 }
 0x1ea   : > { %p796_p1 = pnand %p795_p0, %p789_p9 }
 0x1ec   : > { %799 = shalt.err (!%p796_p1)
}
 0x1ed   : > { %712 = dma.vmem_to_hbm [thread:$0]  (%p926_p4), %s1020_s15, 128, %s1018_s24, %s475_s25  }
 0x1ee PF: > { %p718_p2 = scmp.ge.s32.totalorder %s850_s23, 2  ;;  %s500_s14 = sand.u32 1, %s830_s18  }
 0x1ef   : > { %s501_s16 = scalar_lea.sflag [#allocation3], %s500_s14 }
 0x1f0   : > { %p715_p3 = pnand %p718_p2, %p933_p8 }
 0x1f2   : > { %825 = dma.done.wait (!%p715_p3), %s501_s16, 128  }
 0x1f3   : > { %827 = vsyncadd (!%p715_p3), %s501_s16, 4294967168  ;;  %s18_s23 = sadd.s32 1, %s850_s23   ;;  %s1074_s18 = smov %s834_s19 }
 0x1f4   : > { %p15_p5 = scmp.ge.s32.totalorder %s18_s23, 4   ;;  %s1075_s19 = smov %s838_s20 }
 0x1f5   : > { %s1076_s20 = smov %s939_s6  ;;  %s1077_s21 = smov %s846_s22 }
 0x1f6   : > { %s1078_s22 = smov %s1080_s26  ;;  %17 = sbr.rel (!%p15_p5) target bundleno = 4 (0x4), region = 84 }
 0x1fd   :  { %506 = vsyncpa [#allocation3], 1 }
 0x1fe   :  { %508 = vsyncpa [#allocation3 + $0x1], 1 }

</bundles_post_ra>
